<compile_context>
chip_gen: v6e
topology: v6e:2x2x1
jax: 0.10.0
libtpu: 0.0.40
codegen_flags: <defaults>
</compile_context>

<pallas_src>
import functools

import jax
import jax.numpy as jnp
from jax.experimental import pallas as pl
from jax.experimental.pallas import tpu as pltpu

H1, H2, H3 = 48, 96, 96
BN_EPS = 1e-5
LANE = 128


def _round_up(n, m):
    return (n + m - 1) // m * m


def fcn_kernel(x_ref, w1_ref, w_ref, b_ref, o_ref):
    # x_ref : (TILE_B, DIN) f32      w1_ref: (DIN, D) bf16
    # w_ref : (3, D, D)     bf16     b_ref : (4, 1, D) f32  (BN already folded in)
    # o_ref : (TILE_B, D)   f32
    bf16 = jnp.bfloat16

    h = jnp.dot(x_ref[...].astype(bf16), w1_ref[...],
                preferred_element_type=jnp.float32)
    h = jnp.maximum(h + b_ref[0], 0.0)            # f32 epilogue on the f32 accumulator

    h = jnp.dot(h.astype(bf16), w_ref[0], preferred_element_type=jnp.float32)
    h = jnp.maximum(h + b_ref[1], 0.0)

    h = jnp.dot(h.astype(bf16), w_ref[1], preferred_element_type=jnp.float32)
    h = jnp.maximum(h + b_ref[2], 0.0)

    out = jnp.dot(h.astype(bf16), w_ref[2], preferred_element_type=jnp.float32)
    o_ref[...] = (out + b_ref[3]).astype(o_ref.dtype)


def fold_and_pack_params(params, input_size, output_size):
    """Fold eval-mode BN into the Linears, pad widths to 128 lanes, pack, cast weights to bf16.

    Run ONCE at load time (eager); the results feed the jitted forward.
    """
    D = max(LANE, _round_up(max(H1, H2, H3, output_size), LANE))
    dims = [(input_size, H1), (H1, H2), (H2, H3), (H3, output_size)]

    folded_w, folded_b = [], []
    for li, (din, dout) in enumerate(dims, start=1):
        w = params[f"w{li}"].astype(jnp.float32)
        b = params[f"b{li}"].astype(jnp.float32)
        if li < 4:  # BatchNorm1d after the first three Linears
            scale = params[f"g{li}"] / jnp.sqrt(params[f"v{li}"] + BN_EPS)
            shift = params[f"be{li}"] - params[f"m{li}"] * scale
            w = w * scale            # scale each output column
            b = b * scale + shift
        folded_w.append(w)
        folded_b.append(b)

    # Layer 1 keeps its real K (= input_size); layers 2-4 are padded to (D, D) and stacked.
    w1_packed = jnp.zeros((input_size, D), jnp.float32).at[:, :H1].set(folded_w[0])
    w1_packed = w1_packed.astype(jnp.bfloat16)

    w_packed = jnp.zeros((3, D, D), jnp.float32)
    b_packed = jnp.zeros((4, 1, D), jnp.float32)
    b_packed = b_packed.at[0, :, :H1].set(folded_b[0])
    for i, (din, dout) in enumerate(dims[1:]):
        w_packed = w_packed.at[i, :din, :dout].set(folded_w[i + 1])
        b_packed = b_packed.at[i + 1, :, :dout].set(folded_b[i + 1])
    w_packed = w_packed.astype(jnp.bfloat16)

    return w1_packed, w_packed, b_packed


@functools.partial(jax.jit, static_argnames=("output_size", "tile_b"))
def fcn_forward(x, w1_packed, w_packed, b_packed, *, output_size, tile_b=1024):
    """x: (B, input_size) float32. Packed params come from fold_and_pack_params (load time)."""
    B, DIN = x.shape
    D = w_packed.shape[-1]

    # Batch tiling: multiples of 8 sublanes; cap the tile so the grid has >= 2 steps
    # whenever the batch can be split (keeps v7x's 2nd TensorCore busy via "parallel").
    B8 = _round_up(B, 8)
    tile_cap = _round_up(tile_b, 8)
    if B8 >= 16:
        tile_cap = min(tile_cap, _round_up((B8 + 1) // 2, 8))
    TILE_B = min(tile_cap, B8)
    Bp = _round_up(B8, TILE_B)

    x_p = x if Bp == B else jnp.pad(x, ((0, Bp - B), (0, 0)))

    out_p = pl.pallas_call(
        fcn_kernel,
        out_shape=jax.ShapeDtypeStruct((Bp, D), jnp.float32),
        grid=(Bp // TILE_B,),
        in_specs=[
            pl.BlockSpec((TILE_B, DIN), lambda i: (i, 0)),   # activations: tiled over batch
            pl.BlockSpec((DIN, D), lambda i: (0, 0)),        # layer-1 weight: VMEM-resident
            pl.BlockSpec((3, D, D), lambda i: (0, 0, 0)),    # packed layer 2-4 weights
            pl.BlockSpec((4, 1, D), lambda i: (0, 0, 0)),    # packed (folded) biases
        ],
        out_specs=pl.BlockSpec((TILE_B, D), lambda i: (i, 0)),
        compiler_params=pltpu.CompilerParams(
            dimension_semantics=("parallel",),               # shard batch steps across TCs
        ),
    )(x_p, w1_packed, w_packed, b_packed)

    return out_p[:B, :output_size]


def init_params(key, input_size, output_size):
    """Synthetic parameters matching the PyTorch module (raw, un-folded)."""
    dims = [(input_size, H1), (H1, H2), (H2, H3), (H3, output_size)]
    keys = jax.random.split(key, 6 * len(dims))
    params = {}
    for li, (din, dout) in enumerate(dims, start=1):
        k = keys[6 * (li - 1): 6 * li]
        bound = 1.0 / jnp.sqrt(jnp.float32(din))
        params[f"w{li}"] = jax.random.uniform(k[0], (din, dout), jnp.float32, -bound, bound)
        params[f"b{li}"] = jax.random.uniform(k[1], (1, dout), jnp.float32, -bound, bound)
        if li < 4:  # BatchNorm1d(gamma, beta, running_mean, running_var)
            params[f"g{li}"] = 1.0 + 0.1 * jax.random.normal(k[2], (1, dout), jnp.float32)
            params[f"be{li}"] = 0.1 * jax.random.normal(k[3], (1, dout), jnp.float32)
            params[f"m{li}"] = 0.05 * jax.random.normal(k[4], (1, dout), jnp.float32)
            params[f"v{li}"] = jnp.abs(1.0 + 0.1 * jax.random.normal(k[5], (1, dout), jnp.float32))
    return params


def fcn_reference(x, p):
    """Pure-JAX f32 reference: un-fused Linear -> BN(running stats) -> ReLU, then final Linear."""
    def layer(h, i):
        h = h @ p[f"w{i}"] + p[f"b{i}"]
        h = (h - p[f"m{i}"]) / jnp.sqrt(p[f"v{i}"] + BN_EPS) * p[f"g{i}"] + p[f"be{i}"]
        return jnp.maximum(h, 0.0)

    h = layer(x, 1)
    h = layer(h, 2)   # Dropout = identity at inference
    h = layer(h, 3)   # Dropout = identity at inference
    return h @ p["w4"] + p["b4"]


if __name__ == "__main__":
    key = jax.random.PRNGKey(0)
    k_param, k_x = jax.random.split(key)

    batch, input_size, output_size = 8, 32, 10
    params = init_params(k_param, input_size, output_size)
    x = jax.random.normal(k_x, (batch, input_size), jnp.float32)

    # Fold BN + pack + bf16-cast the weights ONCE; the jitted forward is then a single
    # pallas_call (plus optional batch pad and the output slice) per call.
    w1_p, w_p, b_p = fold_and_pack_params(params, input_size, output_size)

    out = jax.block_until_ready(
        fcn_forward(x, w1_p, w_p, b_p, output_size=output_size))

    ref = fcn_reference(x, params)
    assert out.shape == (batch, output_size), out.shape
    # bf16 weights/activations (f32 accumulation) vs f32 reference -> looser tolerance.
    assert jnp.allclose(out, ref, atol=5e-2, rtol=5e-2), "mismatch vs reference"

    print("KERNEL_OK")
</pallas_src>

<mosaic_0001>
module attributes {stable_mosaic.version = 11 : i64} {
  func.func @fcn_kernel(%arg0: i32, %arg1: memref<8x32xf32, #tpu.memory_space<vmem>>, %arg2: memref<32x128xbf16, #tpu.memory_space<vmem>>, %arg3: memref<3x128x128xbf16, #tpu.memory_space<vmem>>, %arg4: memref<4x1x128xf32, #tpu.memory_space<vmem>>, %arg5: memref<8x128xf32, #tpu.memory_space<vmem>>) attributes {dimension_semantics = [#tpu.dimension_semantics<parallel>], iteration_bounds = array<i64: 1>, scalar_prefetch = 0 : i64, scratch_operands = 0 : i64, tpu.core_type = #tpu.core_type<tc>, window_params = [{transform_indices = @transform_0, window_bounds = array<i64: 8, 32>}, {pipeline_mode = #tpu.pipeline_mode<synchronous>, transform_indices = @transform_1, window_bounds = array<i64: 32, 128>}, {pipeline_mode = #tpu.pipeline_mode<synchronous>, transform_indices = @transform_2, window_bounds = array<i64: 3, 128, 128>}, {pipeline_mode = #tpu.pipeline_mode<synchronous>, transform_indices = @transform_3, window_bounds = array<i64: 4, 1, 128>}, {transform_indices = @transform_4, window_bounds = array<i64: 8, 128>}]} {
    %c0 = arith.constant 0 : index
    %c0_0 = arith.constant 0 : index
    %0 = vector.load %arg1[%c0, %c0_0] : memref<8x32xf32, #tpu.memory_space<vmem>>, vector<8x32xf32>
    %1 = arith.truncf %0 : vector<8x32xf32> to vector<8x32xbf16>
    %c0_1 = arith.constant 0 : index
    %c0_2 = arith.constant 0 : index
    %2 = vector.load %arg2[%c0_1, %c0_2] : memref<32x128xbf16, #tpu.memory_space<vmem>>, vector<32x128xbf16>
    %cst = arith.constant dense<0.000000e+00> : vector<8x128xf32>
    %3 = tpu.matmul %1, %2, %cst {dimension_numbers = #tpu.dot_dimension_numbers<[1], [0], [0], [1], [0, 0, 1, 1], [], []>} : vector<8x32xbf16>, vector<32x128xbf16>, vector<8x128xf32> -> vector<8x128xf32>
    %c0_3 = arith.constant 0 : index
    %c0_4 = arith.constant 0 : index
    %c0_5 = arith.constant 0 : index
    %4 = vector.load %arg4[%c0_3, %c0_4, %c0_5] : memref<4x1x128xf32, #tpu.memory_space<vmem>>, vector<1x1x128xf32>
    %5 = vector.shape_cast %4 : vector<1x1x128xf32> to vector<1x128xf32>
    %6 = vector.broadcast %5 : vector<1x128xf32> to vector<8x128xf32>
    %7 = arith.addf %3, %6 : vector<8x128xf32>
    %cst_6 = arith.constant 0.000000e+00 : f32
    %8 = vector.broadcast %cst_6 : f32 to vector<8x128xf32>
    %9 = arith.maximumf %7, %8 : vector<8x128xf32>
    %10 = arith.truncf %9 : vector<8x128xf32> to vector<8x128xbf16>
    %c0_7 = arith.constant 0 : index
    %c0_8 = arith.constant 0 : index
    %c0_9 = arith.constant 0 : index
    %11 = vector.load %arg3[%c0_7, %c0_8, %c0_9] : memref<3x128x128xbf16, #tpu.memory_space<vmem>>, vector<1x128x128xbf16>
    %12 = vector.shape_cast %11 : vector<1x128x128xbf16> to vector<128x128xbf16>
    %cst_10 = arith.constant dense<0.000000e+00> : vector<8x128xf32>
    %13 = tpu.matmul %10, %12, %cst_10 {dimension_numbers = #tpu.dot_dimension_numbers<[1], [0], [0], [1], [0, 0, 1, 1], [], []>} : vector<8x128xbf16>, vector<128x128xbf16>, vector<8x128xf32> -> vector<8x128xf32>
    %c1 = arith.constant 1 : index
    %c0_11 = arith.constant 0 : index
    %c0_12 = arith.constant 0 : index
    %14 = vector.load %arg4[%c1, %c0_11, %c0_12] : memref<4x1x128xf32, #tpu.memory_space<vmem>>, vector<1x1x128xf32>
    %15 = vector.shape_cast %14 : vector<1x1x128xf32> to vector<1x128xf32>
    %16 = vector.broadcast %15 : vector<1x128xf32> to vector<8x128xf32>
    %17 = arith.addf %13, %16 : vector<8x128xf32>
    %cst_13 = arith.constant 0.000000e+00 : f32
    %18 = vector.broadcast %cst_13 : f32 to vector<8x128xf32>
    %19 = arith.maximumf %17, %18 : vector<8x128xf32>
    %20 = arith.truncf %19 : vector<8x128xf32> to vector<8x128xbf16>
    %c1_14 = arith.constant 1 : index
    %c0_15 = arith.constant 0 : index
    %c0_16 = arith.constant 0 : index
    %21 = vector.load %arg3[%c1_14, %c0_15, %c0_16] : memref<3x128x128xbf16, #tpu.memory_space<vmem>>, vector<1x128x128xbf16>
    %22 = vector.shape_cast %21 : vector<1x128x128xbf16> to vector<128x128xbf16>
    %cst_17 = arith.constant dense<0.000000e+00> : vector<8x128xf32>
    %23 = tpu.matmul %20, %22, %cst_17 {dimension_numbers = #tpu.dot_dimension_numbers<[1], [0], [0], [1], [0, 0, 1, 1], [], []>} : vector<8x128xbf16>, vector<128x128xbf16>, vector<8x128xf32> -> vector<8x128xf32>
    %c2 = arith.constant 2 : index
    %c0_18 = arith.constant 0 : index
    %c0_19 = arith.constant 0 : index
    %24 = vector.load %arg4[%c2, %c0_18, %c0_19] : memref<4x1x128xf32, #tpu.memory_space<vmem>>, vector<1x1x128xf32>
    %25 = vector.shape_cast %24 : vector<1x1x128xf32> to vector<1x128xf32>
    %26 = vector.broadcast %25 : vector<1x128xf32> to vector<8x128xf32>
    %27 = arith.addf %23, %26 : vector<8x128xf32>
    %cst_20 = arith.constant 0.000000e+00 : f32
    %28 = vector.broadcast %cst_20 : f32 to vector<8x128xf32>
    %29 = arith.maximumf %27, %28 : vector<8x128xf32>
    %30 = arith.truncf %29 : vector<8x128xf32> to vector<8x128xbf16>
    %c2_21 = arith.constant 2 : index
    %c0_22 = arith.constant 0 : index
    %c0_23 = arith.constant 0 : index
    %31 = vector.load %arg3[%c2_21, %c0_22, %c0_23] : memref<3x128x128xbf16, #tpu.memory_space<vmem>>, vector<1x128x128xbf16>
    %32 = vector.shape_cast %31 : vector<1x128x128xbf16> to vector<128x128xbf16>
    %cst_24 = arith.constant dense<0.000000e+00> : vector<8x128xf32>
    %33 = tpu.matmul %30, %32, %cst_24 {dimension_numbers = #tpu.dot_dimension_numbers<[1], [0], [0], [1], [0, 0, 1, 1], [], []>} : vector<8x128xbf16>, vector<128x128xbf16>, vector<8x128xf32> -> vector<8x128xf32>
    %c3 = arith.constant 3 : index
    %c0_25 = arith.constant 0 : index
    %c0_26 = arith.constant 0 : index
    %34 = vector.load %arg4[%c3, %c0_25, %c0_26] : memref<4x1x128xf32, #tpu.memory_space<vmem>>, vector<1x1x128xf32>
    %35 = vector.shape_cast %34 : vector<1x1x128xf32> to vector<1x128xf32>
    %36 = vector.broadcast %35 : vector<1x128xf32> to vector<8x128xf32>
    %37 = arith.addf %33, %36 : vector<8x128xf32>
    %c0_27 = arith.constant 0 : index
    %c0_28 = arith.constant 0 : index
    %38 = vector.load %arg5[%c0_27, %c0_28] : memref<8x128xf32, #tpu.memory_space<vmem>>, vector<8x128xf32>
    tpu.vector_store %arg5[%c0_27, %c0_28], %37 {strides = array<i32>} : memref<8x128xf32, #tpu.memory_space<vmem>>, vector<8x128xf32>,
    return
  }
  func.func @transform_0(%arg0: i32) -> (i32, i32) {
    %c0_i32 = arith.constant 0 : i32
    %c0_i32_0 = arith.constant 0 : i32
    return %arg0, %c0_i32 : i32, i32
  }
  func.func @transform_1(%arg0: i32) -> (i32, i32) {
    %c0_i32 = arith.constant 0 : i32
    %c0_i32_0 = arith.constant 0 : i32
    %c0_i32_1 = arith.constant 0 : i32
    return %c0_i32, %c0_i32_0 : i32, i32
  }
  func.func @transform_2(%arg0: i32) -> (i32, i32, i32) {
    %c0_i32 = arith.constant 0 : i32
    %c0_i32_0 = arith.constant 0 : i32
    %c0_i32_1 = arith.constant 0 : i32
    %c0_i32_2 = arith.constant 0 : i32
    return %c0_i32, %c0_i32_0, %c0_i32_1 : i32, i32, i32
  }
  func.func @transform_3(%arg0: i32) -> (i32, i32, i32) {
    %c0_i32 = arith.constant 0 : i32
    %c0_i32_0 = arith.constant 0 : i32
    %c0_i32_1 = arith.constant 0 : i32
    %c0_i32_2 = arith.constant 0 : i32
    return %c0_i32, %c0_i32_0, %c0_i32_1 : i32, i32, i32
  }
  func.func @transform_4(%arg0: i32) -> (i32, i32) {
    %c0_i32 = arith.constant 0 : i32
    %c0_i32_0 = arith.constant 0 : i32
    return %arg0, %c0_i32 : i32, i32
  }
}

</mosaic_0001>

<bundles_post_ra>
// kernel: fcn_forward.1
= control target key start
LH: loop header
LB: loop body
LE: loop exit
PB: predicated region body
PF: predicated region fallthrough
CT: control target
= control target key end

     0   :  { %9 = vsyncpa [#allocation3], 0  ;;  %s831_s0 = inlined_call_operand.hbm [shape: f32[8,32], index: 0, kind: input, shape index: {}]   ;;  %s832_s1 = inlined_call_operand.hbm [shape: bf16[32,128], index: 1, kind: input, shape index: {}]   ;;  %s833_s2 = inlined_call_operand.hbm [shape: bf16[3,128,128], index: 2, kind: input, shape index: {}]   ;;  %s834_s3 = inlined_call_operand.vmem [shape: f32[4,1,128], index: 3, kind: input, shape index: {}]   ;;  %s835_s4 = inlined_call_operand.hbm [shape: f32[8,128], index: 4, kind: output, shape index: {}]  }
   0x1   :  { %10 = vsyncpa [#allocation6], 0 }
   0x2   :  { %11 = vsyncpa [#allocation4], 0  ;;  %s740_s15 = smov [#allocation5]  }
   0x3   :  { %s27_s16 = sshll.u32 %s740_s15, 4  ;;  %s28_s16 = int_to_ptr.vmem [resolvable:$true] %s27_s16 }
   0x4   :  { %s662_s17 = scalar_lea.vmem %s28_s16, 256  ;;  %p667_p1 = scmp.lt.s32.totalorder %s28_s16, %s28_s16 }
   0x5   :  { %p663_p0 = scmp.ne.s32.totalorder %s28_s16, %s662_s17  ;;  %p668_p2 = scmp.lt.s32.totalorder %s662_s17, %s662_s17 }
   0x7   :  { %p669_p3 = por %p668_p2, %p667_p1 }
   0x9   :  { %p670_p4 = pnand %p669_p3, %p663_p0 }
   0xb   :  { %673 = shalt.err (!%p670_p4)
}
   0xc   :  { %s741_s18 = smov 64   ;;  %s742_s19 = smov 4  }
   0xd   :  { %33 = dma.hbm_to_vmem [thread:$0]  %s832_s1, 256, %s28_s16, [#allocation6], %s741_s18, %s741_s18, %s742_s19  }
   0xe   :  { %s743_s22 = smov [#allocation2]   ;;  %s744_s24 = smov [#allocation7]  }
   0xf   :  { %s18_s23 = sshll.u32 %s743_s22, 4  ;;  %s39_s25 = sshll.u32 %s744_s24, 4  ;;  %s19_s23 = int_to_ptr.vmem [resolvable:$true] %s18_s23  ;;  %s40_s25 = int_to_ptr.vmem [resolvable:$true] %s39_s25 }
  0x10   :  { %s682_s26 = scalar_lea.vmem %s19_s23, 128  ;;  %p687_p6 = scmp.lt.s32.totalorder %s19_s23, %s19_s23 }
  0x11   :  { %p683_p5 = scmp.ne.s32.totalorder %s19_s23, %s682_s26  ;;  %p688_p7 = scmp.lt.s32.totalorder %s682_s26, %s682_s26 }
  0x13   :  { %p689_p8 = por %p688_p7, %p687_p6 }
  0x15   :  { %p690_p9 = pnand %p689_p8, %p683_p5 }
  0x17   :  { %693 = shalt.err (!%p690_p9)
}
  0x18   :  { %21 = dma.hbm_to_vmem [thread:$0]  %s831_s0, 128, %s19_s23, [#allocation3]  }
  0x19   :  { %s702_s29 = scalar_lea.vmem %s40_s25, 3072  ;;  %p707_p11 = scmp.lt.s32.totalorder %s40_s25, %s40_s25 }
  0x1a   :  { %p703_p10 = scmp.ne.s32.totalorder %s40_s25, %s702_s29  ;;  %p708_p12 = scmp.lt.s32.totalorder %s702_s29, %s702_s29 }
  0x1c   :  { %p709_p13 = por %p708_p12, %p707_p11 }
  0x1e   :  { %p710_p0 = pnand %p709_p13, %p703_p10 }
  0x20   :  { %713 = shalt.err (!%p710_p0)
}
  0x21   :  { %45 = dma.hbm_to_vmem [thread:$0]  %s833_s2, 3072, %s40_s25, [#allocation6], %s741_s18, %s741_s18, %s742_s19  }
  0x22   :  { %734 = dma.done.wait [#allocation3], 128  }
  0x23   :  { %735 = vsyncadd [#allocation3], 4294967168 }
  0x24   :  { %736 = dma.done.wait [#allocation6], 3328  }
  0x25   :  { %737 = vsyncadd [#allocation6], 4294963968  ;;  %v745_v0 = vmov 0.0   ;;  %vm746_vm0 = vmmov 0   ;;  %v628_v1 = vld [vmem:[#allocation5 + $0x8] sm:$0xff]   ;;  %v629_v2 = vld [vmem:[#allocation5] sm:$0xff]  }
  0x26   :  { %552 = vmatprep.subr.bf16.mxu0 %v745_v0  ;;  %556 = vmatprep.mubr.msk.bf16.mxu0 %vm746_vm0, %v745_v0  ;;  %v58_v3 = vld [vmem:[#allocation2] sm:$0xff]  ;;  %v630_v4 = vld [vmem:[#allocation7 + $0x38] sm:$0xff]   ;;  %v631_v6 = vld [vmem:[#allocation7 + $0x30] sm:$0xff]   ;;  %vm83_vm1 = vcmask 261120   ;;  %s747_s11 = smov [#allocation8]  }
  0x27   :  { %560 = vmatprep.subr.bf16.mxu1 %v745_v0  ;;  %576 = vmatprep.mubr.msk.bf16.mxu1 %vm746_vm0, %v745_v0  ;;  %v59_v5 = vpack.c.bf16 %v58_v3, %v58_v3  ;;  %v632_v7 = vld [vmem:[#allocation7 + $0x28] sm:$0xff]   ;;  %v633_v8 = vld [vmem:[#allocation7 + $0x20] sm:$0xff]   ;;  %v634_v9 = vld [vmem:[#allocation7 + $0x18] sm:$0xff]   ;;  %s478_s12 = sshll.u32 %s747_s11, 4  ;;  %s479_s12 = int_to_ptr.vmem [resolvable:$true] %s478_s12 }
  0x28   :  { %553 = vmatpush3.bf16.msra.mxu0 %v628_v1  ;;  %561 = vmatpush3.bf16.msra.mxu1 %v630_v4  ;;  %v635_v10 = vld [vmem:[#allocation7 + $0x10] sm:$0xff]   ;;  %v636_v11 = vld [vmem:[#allocation7 + $0x8] sm:$0xff]   ;;  %v637_v12 = vld [vmem:[#allocation7] sm:$0xff]   ;;  %s714_s13 = scalar_lea.vmem %s479_s12, 128  ;;  %p719_p2 = scmp.lt.s32.totalorder %s479_s12, %s479_s12 }
  0x29   :  { %554 = vmatprep.subr.bf16.mxu0 %v745_v0  ;;  %562 = vmatprep.subr.bf16.mxu1 %v745_v0  ;;  %v638_v13 = vld [vmem:[#allocation7 + $0x78] sm:$0xff]   ;;  %v639_v14 = vld [vmem:[#allocation7 + $0x70] sm:$0xff]   ;;  %v640_v15 = vld [vmem:[#allocation7 + $0x68] sm:$0xff]   ;;  %p715_p1 = scmp.ne.s32.totalorder %s479_s12, %s714_s13  ;;  %p720_p3 = scmp.lt.s32.totalorder %s714_s13, %s714_s13 }
  0x2a   :  { %v641_v16 = vld [vmem:[#allocation7 + $0x60] sm:$0xff]   ;;  %v642_v17 = vld [vmem:[#allocation7 + $0x58] sm:$0xff]   ;;  %v643_v18 = vld [vmem:[#allocation7 + $0x50] sm:$0xff]  }
  0x2b   :  { %v488_v19 = vld [vmem:[%s834_s3] ss:$0 sm:$0xff]  ;;  %v645_v28 = vld [vmem:[#allocation7 + $0x40] sm:$0xff]   ;;  %v646_v29 = vld [vmem:[#allocation7 + $0xb8] sm:$0xff]   ;;  %p721_p4 = por %p720_p3, %p719_p2 }
  0x2c   :  { %555 = vmatpush3.bf16.msra.mxu0 %v629_v2  ;;  %563 = vmatpush3.bf16.msra.mxu1 %v631_v6  ;;  %v644_v27 = vld [vmem:[#allocation7 + $0x48] sm:$0xff]   ;;  %v647_v30 = vld [vmem:[#allocation7 + $0xb0] sm:$0xff]   ;;  %v649_v32 = vld [vmem:[#allocation7 + $0xa0] sm:$0xff]  }
  0x2d   :  { %580 = vmatprep.subr.bf16.mxu0 %v745_v0  ;;  %564 = vmatprep.subr.bf16.mxu1 %v745_v0  ;;  %v648_v31 = vld [vmem:[#allocation7 + $0xa8] sm:$0xff]   ;;  %v650_v33 = vld [vmem:[#allocation7 + $0x98] sm:$0xff]   ;;  %v651_v34 = vld [vmem:[#allocation7 + $0x90] sm:$0xff]   ;;  %p722_p5 = pnand %p721_p4, %p715_p1 }
  0x2e   :  { %v493_v35 = vld [vmem:[%s834_s3 + $0x1] ss:$0 sm:$0xff]  ;;  %v653_v44 = vld [vmem:[#allocation7 + $0x80] sm:$0xff]   ;;  %v503_v45 = vld [vmem:[%s834_s3 + $0x2] ss:$0 sm:$0xff] }
  0x2f   :  { %557 = vmatmul.mubr.msk.bf16.vlgmr.msra.gmra.mxu0 %vm83_vm1, %v59_v5  ;;  %v652_v43 = vld [vmem:[#allocation7 + $0x88] sm:$0xff]  }
  0x30   :  { %596 = vmatprep.mubr.msk.bf16.mxu0 %vm746_vm0, %v745_v0  ;;  %565 = vmatpush3.bf16.msra.mxu1 %v632_v7  ;;  %v513_v53 = vld [vmem:[%s834_s3 + $0x3] ss:$0 sm:$0xff] }
  0x31   :  { %566 = vmatprep.subr.bf16.mxu1 %v745_v0  ;;  %581 = vmatpush3.bf16.msra.mxu0 %v638_v13 }
  0x32   :  { %582 = vmatprep.subr.bf16.mxu0 %v745_v0 }
  0x34   :  { %567 = vmatpush3.bf16.msra.mxu1 %v633_v8 }
  0x35   :  { %568 = vmatprep.subr.bf16.mxu1 %v745_v0  ;;  %583 = vmatpush3.bf16.msra.mxu0 %v639_v14 }
  0x36   :  { %584 = vmatprep.subr.bf16.mxu0 %v745_v0 }
  0x38   :  { %569 = vmatpush3.bf16.msra.mxu1 %v634_v9 }
  0x39   :  { %570 = vmatprep.subr.bf16.mxu1 %v745_v0  ;;  %585 = vmatpush3.bf16.msra.mxu0 %v640_v15 }
  0x3a   :  { %586 = vmatprep.subr.bf16.mxu0 %v745_v0 }
  0x3c   :  { %571 = vmatpush3.bf16.msra.mxu1 %v635_v10 }
  0x3d   :  { %572 = vmatprep.subr.bf16.mxu1 %v745_v0  ;;  %587 = vmatpush3.bf16.msra.mxu0 %v641_v16 }
  0x3e   :  { %588 = vmatprep.subr.bf16.mxu0 %v745_v0 }
  0x40   :  { %573 = vmatpush3.bf16.msra.mxu1 %v636_v11 }
  0x41   :  { %574 = vmatprep.subr.bf16.mxu1 %v745_v0  ;;  %589 = vmatpush3.bf16.msra.mxu0 %v642_v17 }
  0x42   :  { %590 = vmatprep.subr.bf16.mxu0 %v745_v0 }
  0x44   :  { %575 = vmatpush3.bf16.msra.mxu1 %v637_v12 }
  0x45   :  { %600 = vmatprep.subr.bf16.mxu1 %v745_v0  ;;  %591 = vmatpush3.bf16.msra.mxu0 %v643_v18 }
  0x46   :  { %592 = vmatprep.subr.bf16.mxu0 %v745_v0 }
  0x49   :  { %593 = vmatpush3.bf16.msra.mxu0 %v644_v27 }
  0x4a   :  { %594 = vmatprep.subr.bf16.mxu0 %v745_v0 }
  0x4d   :  { %595 = vmatpush3.bf16.msra.mxu0 %v645_v28 }
  0xef   :  { %v121_v20 = vpop.f32.mrf.mxu0 }
  0xf0   :  { %v122_v21 = vadd.f32 %v488_v19, %v121_v20 }
  0xf1   :  { %v558_v22 = vpop.f32.mrf.mxu0 }
  0xf2   :  { %v127_v23 = vmax.f32 %v122_v21, 0.0 }
  0xf3   :  { %v124_v24 = vpop.f32.mrf.mxu0 }
  0xf4   :  { %v128_v25 = vpack.c.bf16 %v127_v23, %v127_v23 }
  0xf5   :  { %v559_v26 = vpop.f32.mrf.mxu0 }
  0xf6   :  { %577 = vmatmul.mubr.bf16.vlgmr.msra.gmra.mxu1 %v128_v25 }
  0xf7   :  { %616 = vmatprep.mubr.msk.bf16.mxu1 %vm746_vm0, %v745_v0  ;;  %601 = vmatpush3.bf16.msra.mxu1 %v646_v29 }
  0xf8   :  { %602 = vmatprep.subr.bf16.mxu1 %v745_v0 }
  0xfb   :  { %603 = vmatpush3.bf16.msra.mxu1 %v647_v30 }
  0xfc   :  { %604 = vmatprep.subr.bf16.mxu1 %v745_v0 }
  0xff   :  { %605 = vmatpush3.bf16.msra.mxu1 %v648_v31 }
 0x100   :  { %606 = vmatprep.subr.bf16.mxu1 %v745_v0 }
 0x103   :  { %607 = vmatpush3.bf16.msra.mxu1 %v649_v32 }
 0x104   :  { %608 = vmatprep.subr.bf16.mxu1 %v745_v0 }
 0x107   :  { %609 = vmatpush3.bf16.msra.mxu1 %v650_v33 }
 0x108   :  { %610 = vmatprep.subr.bf16.mxu1 %v745_v0 }
 0x10b   :  { %611 = vmatpush3.bf16.msra.mxu1 %v651_v34 }
 0x10c   :  { %612 = vmatprep.subr.bf16.mxu1 %v745_v0 }
 0x10f   :  { %613 = vmatpush3.bf16.msra.mxu1 %v652_v43 }
 0x110   :  { %614 = vmatprep.subr.bf16.mxu1 %v745_v0 }
 0x113   :  { %615 = vmatpush3.bf16.msra.mxu1 %v653_v44 }
 0x1b6   :  { %v235_v36 = vpop.f32.mrf.mxu1 }
 0x1b7   :  { %v236_v37 = vadd.f32 %v493_v35, %v235_v36 }
 0x1b8   :  { %v578_v38 = vpop.f32.mrf.mxu1 }
 0x1b9   :  { %v241_v39 = vmax.f32 %v236_v37, 0.0 }
 0x1ba   :  { %v238_v40 = vpop.f32.mrf.mxu1 }
 0x1bb   :  { %v242_v41 = vpack.c.bf16 %v241_v39, %v241_v39 }
 0x1bc   :  { %v579_v42 = vpop.f32.mrf.mxu1 }
 0x1bd   :  { %597 = vmatmul.mubr.bf16.vlgmr.msra.gmra.mxu0 %v242_v41 }
 0x27d   :  { %v350_v46 = vpop.f32.mrf.mxu0 }
 0x27e   :  { %v351_v47 = vadd.f32 %v503_v45, %v350_v46 }
 0x27f   :  { %v598_v48 = vpop.f32.mrf.mxu0 }
 0x280   :  { %v356_v49 = vmax.f32 %v351_v47, 0.0 }
 0x281   :  { %v353_v50 = vpop.f32.mrf.mxu0 }
 0x282   :  { %v357_v51 = vpack.c.bf16 %v356_v49, %v356_v49 }
 0x283   :  { %v599_v52 = vpop.f32.mrf.mxu0 }
 0x284   :  { %617 = vmatmul.mubr.bf16.vlgmr.msra.gmra.mxu1 %v357_v51 }
 0x344   :  { %v465_v54 = vpop.f32.mrf.mxu1 }
 0x345   :  { %v466_v55 = vadd.f32 %v513_v53, %v465_v54 }
 0x346   :  { %v618_v56 = vpop.f32.mrf.mxu1 }
 0x347   :  { %471 = vst [vmem:[#allocation8] sm:$0xff] %v466_v55 }
 0x348   :  { %v468_v57 = vpop.f32.mrf.mxu1 }
 0x349   :  { %725 = shalt.err (!%p722_p5)
}
 0x34a   :  { %481 = dma.vmem_to_hbm [thread:$0]  %s479_s12, 128, %s835_s4, [#allocation4]   ;;  %v619_v58 = vpop.f32.mrf.mxu1 }
 0x34b   :  { %738 = dma.done.wait [#allocation4], 128  }
 0x34c   :  { %739 = vsyncadd [#allocation4], 4294967168 }
 0x34d   :  { %485 = vsyncpa [#allocation3], 1 }
 0x34e   :  { %486 = vsyncpa [#allocation6], 1 }
 0x34f   :  { %487 = vsyncpa [#allocation4], 1 }

</bundles_post_ra>
